<compile_context>
chip_gen: v5e
topology: v5e:2x2
jax: 0.10.0
libtpu: 0.0.40
codegen_flags: <defaults>
</compile_context>

<pallas_src>
import functools

import jax
import jax.numpy as jnp
from jax.experimental import pallas as pl
from jax.experimental.pallas import tpu as pltpu


def _round_up(v, m):
    return ((v + m - 1) // m) * m


def _ffn_kernel(x_ref, m_ref, w1_ref, b1_ref, w2_ref, b2_ref, o_ref, hbuf,
                *, tt, th, kernel_size, pad_l, activation):
    # x_ref : (Txp, Cin_p)    padded & pre-masked input (resident across t-tiles)
    # m_ref : (Txp, 1)        padded mask, same time layout as x_ref
    # w1_ref: (K*Cin_p, F_p)  conv_1 weights, K taps stacked on the contraction dim
    # b1_ref: (1, F_p)
    # w2_ref: (K*F_p, Cout_p) conv_2 weights, K taps stacked on the contraction dim
    # b2_ref: (1, Cout_p)
    # o_ref : (tt, Cout_p)    output time-tile
    # hbuf  : (th, F_p)       masked hidden activations incl. halo rows
    t = pl.program_id(1)
    base = pl.multiple_of(t * tt, 8)

    # ---- conv_1: one MXU contraction over K * Cin_p ----
    xk = jnp.concatenate(
        [x_ref[pl.ds(base + k, th), :] for k in range(kernel_size)], axis=-1)
    h = jnp.dot(xk, w1_ref[...], preferred_element_type=jnp.float32)
    h = h + b1_ref[...]

    if activation == "gelu":
        h = h * jax.nn.sigmoid(1.702 * h)      # matches the module's gelu approx
    else:
        h = jnp.maximum(h, 0.0)
    # TODO(synk): nn.Dropout(p_dropout) is identity at inference; not implemented.

    hmask = m_ref[pl.ds(base + pad_l, th), :]                     # (th, 1)
    hbuf[...] = (h * hmask).astype(hbuf.dtype)

    # ---- conv_2: one MXU contraction over K * F_p ----
    hk = jnp.concatenate(
        [hbuf[pl.ds(k, tt), :] for k in range(kernel_size)], axis=-1)
    y = jnp.dot(hk, w2_ref[...], preferred_element_type=jnp.float32)
    y = y + b2_ref[...]

    omask = m_ref[pl.ds(base + 2 * pad_l, tt), :]                 # (tt, 1)
    o_ref[...] = (y * omask).astype(o_ref.dtype)


def ffn_forward(x_nct, mask_n1t, w1, b1, w2, b2, *,
                kernel_size, activation=None, causal=False,
                time_tile=512, vmem_limit_bytes=None):
    """x_nct: (B, Cin, T); mask_n1t: (B, 1, T); w1: (F, Cin, K); w2: (Cout, F, K)."""
    B, Cin, T = x_nct.shape
    Fch = w1.shape[0]
    Cout = w2.shape[0]
    K = kernel_size
    if K == 1:
        pad_l = 0
    elif causal:
        pad_l = K - 1
    else:
        pad_l = (K - 1) // 2

    dtype = x_nct.dtype

    # lane-dense channel padding (multiples of 128)
    cin_p = _round_up(Cin, 128)
    f_p = _round_up(Fch, 128)
    cout_p = _round_up(Cout, 128)

    # time tiling: tt output rows per grid step, th = tt + 8-aligned halo
    tt = min(time_tile, _round_up(T, 8))
    n_t = pl.cdiv(T, tt)
    t_r = n_t * tt
    rk = _round_up(K - 1, 8) if K > 1 else 0
    th = tt + rk
    txp = t_r + 2 * rk

    # channels-last, masked, zero-padded in time (padded row p + 2*pad_l holds
    # original time position p) and padded in channels.
    x_t = jnp.transpose(x_nct, (0, 2, 1))                              # (B, T, Cin)
    m_t = jnp.transpose(mask_n1t, (0, 2, 1)).astype(jnp.float32)       # (B, T, 1)
    xm = (x_t * m_t).astype(dtype)
    x_p = jnp.zeros((B, txp, cin_p), dtype)
    x_p = x_p.at[:, 2 * pad_l:2 * pad_l + T, :Cin].set(xm)
    m_p = jnp.zeros((B, txp, 1), jnp.float32)
    m_p = m_p.at[:, 2 * pad_l:2 * pad_l + T, :].set(m_t)

    # fold the K taps into the contraction dimension of the weights
    w1_t = jnp.transpose(w1, (2, 1, 0))                                # (K, Cin, F)
    w1_f = jnp.zeros((K, cin_p, f_p), dtype)
    w1_f = w1_f.at[:, :Cin, :Fch].set(w1_t.astype(dtype)).reshape(K * cin_p, f_p)
    w2_t = jnp.transpose(w2, (2, 1, 0))                                # (K, F, Cout)
    w2_f = jnp.zeros((K, f_p, cout_p), dtype)
    w2_f = w2_f.at[:, :Fch, :Cout].set(w2_t.astype(dtype)).reshape(K * f_p, cout_p)
    b1_p = jnp.zeros((1, f_p), jnp.float32).at[0, :Fch].set(b1.astype(jnp.float32))
    b2_p = jnp.zeros((1, cout_p), jnp.float32).at[0, :Cout].set(b2.astype(jnp.float32))

    kernel = functools.partial(_ffn_kernel, tt=tt, th=th, kernel_size=K,
                               pad_l=pad_l, activation=activation)

    cparams = dict(dimension_semantics=("parallel", "parallel"))
    if vmem_limit_bytes is not None:        # re-derive per target (64 MiB on v7x)
        cparams["vmem_limit_bytes"] = vmem_limit_bytes

    out = pl.pallas_call(
        kernel,
        out_shape=jax.ShapeDtypeStruct((B, t_r, cout_p), dtype),
        grid_spec=pltpu.PrefetchScalarGridSpec(
            num_scalar_prefetch=0,
            grid=(B, n_t),
            in_specs=[
                pl.BlockSpec((None, txp, cin_p), lambda b, t: (b, 0, 0)),
                pl.BlockSpec((None, txp, 1), lambda b, t: (b, 0, 0)),
                pl.BlockSpec((K * cin_p, f_p), lambda b, t: (0, 0)),
                pl.BlockSpec((1, f_p), lambda b, t: (0, 0)),
                pl.BlockSpec((K * f_p, cout_p), lambda b, t: (0, 0)),
                pl.BlockSpec((1, cout_p), lambda b, t: (0, 0)),
            ],
            out_specs=pl.BlockSpec((None, tt, cout_p), lambda b, t: (b, t, 0)),
            scratch_shapes=[
                pltpu.VMEM((th, f_p), dtype),   # masked hidden (+halo), input dtype
            ],
        ),
        compiler_params=pltpu.CompilerParams(**cparams),
    )(x_p, m_p, w1_f, b1_p, w2_f, b2_p)

    out = out[:, :T, :Cout]
    return jnp.transpose(out, (0, 2, 1))                               # (B, Cout, T)


def ffn_reference(x, mask, w1, b1, w2, b2, *, kernel_size, activation, causal):
    """Plain-JAX reference mirroring the PyTorch forward (NCT layout)."""
    def pad(v):
        if kernel_size == 1:
            return v
        if causal:
            pl_, pr_ = kernel_size - 1, 0
        else:
            pl_, pr_ = (kernel_size - 1) // 2, kernel_size // 2
        return jnp.pad(v, ((0, 0), (0, 0), (pl_, pr_)))

    def conv1d(v, w, b):
        out = jax.lax.conv_general_dilated(
            v, w, window_strides=(1,), padding="VALID",
            dimension_numbers=("NCH", "OIH", "NCH"))
        return out + b[None, :, None]

    h = conv1d(pad(x * mask), w1, b1)
    if activation == "gelu":
        h = h * jax.nn.sigmoid(1.702 * h)
    else:
        h = jnp.maximum(h, 0.0)
    h = conv1d(pad(h * mask), w2, b2)
    return h * mask


def _run_case(key, *, B, Cin, Cout, Fch, K, T, activation, causal, lengths,
              time_tile=512):
    k_x, k_w1, k_b1, k_w2, k_b2 = jax.random.split(key, 5)
    x = jax.random.normal(k_x, (B, Cin, T), dtype=jnp.float32)
    mask = (jnp.arange(T)[None, None, :]
            < jnp.asarray(lengths, jnp.int32)[:, None, None]).astype(jnp.float32)
    w1 = jax.random.normal(k_w1, (Fch, Cin, K), dtype=jnp.float32) * 0.1
    b1 = jax.random.normal(k_b1, (Fch,), dtype=jnp.float32) * 0.1
    w2 = jax.random.normal(k_w2, (Cout, Fch, K), dtype=jnp.float32) * 0.1
    b2 = jax.random.normal(k_b2, (Cout,), dtype=jnp.float32) * 0.1

    out = ffn_forward(x, mask, w1, b1, w2, b2, kernel_size=K,
                      activation=activation, causal=causal, time_tile=time_tile)
    out = jax.block_until_ready(out)
    ref = ffn_reference(x, mask, w1, b1, w2, b2, kernel_size=K,
                        activation=activation, causal=causal)
    assert out.shape == (B, Cout, T)
    assert jnp.allclose(out, ref, atol=1e-5, rtol=1e-5), \
        f"max err {jnp.max(jnp.abs(out - ref))}"


if __name__ == "__main__":
    key = jax.random.PRNGKey(0)
    k1, k2 = jax.random.split(key)

    # Case 1: small shapes matching the module's test config (gelu, same-pad).
    _run_case(k1, B=2, Cin=4, Cout=4, Fch=32, K=3, T=16,
              activation="gelu", causal=False, lengths=[16, 10])

    # Case 2: exercises multi-tile time axis (time_tile=16 < T), causal padding
    # and the relu path.
    _run_case(k2, B=2, Cin=6, Cout=10, Fch=20, K=5, T=40,
              activation=None, causal=True, lengths=[40, 23], time_tile=16)

    print("KERNEL_OK")
</pallas_src>

<mosaic_0001>
module attributes {stable_mosaic.version = 11 : i64} {
  func.func @_ffn_kernel(%arg0: i32, %arg1: i32, %arg2: memref<1x32x128xf32, #tpu.memory_space<vmem>>, %arg3: memref<1x32x1xf32, #tpu.memory_space<vmem>>, %arg4: memref<384x128xf32, #tpu.memory_space<vmem>>, %arg5: memref<1x128xf32, #tpu.memory_space<vmem>>, %arg6: memref<384x128xf32, #tpu.memory_space<vmem>>, %arg7: memref<1x128xf32, #tpu.memory_space<vmem>>, %arg8: memref<1x16x128xf32, #tpu.memory_space<vmem>>, %arg9: memref<24x128xf32, #tpu.memory_space<vmem>>) attributes {dimension_semantics = [#tpu.dimension_semantics<parallel>, #tpu.dimension_semantics<parallel>], iteration_bounds = array<i64: 2, 1>, scalar_prefetch = 0 : i64, scratch_operands = 1 : i64, tpu.core_type = #tpu.core_type<tc>, window_params = [{transform_indices = @transform_0, window_bounds = array<i64: 1, 32, 128>}, {transform_indices = @transform_1, window_bounds = array<i64: 1, 32, 1>}, {pipeline_mode = #tpu.pipeline_mode<synchronous>, transform_indices = @transform_2, window_bounds = array<i64: 384, 128>}, {pipeline_mode = #tpu.pipeline_mode<synchronous>, transform_indices = @transform_3, window_bounds = array<i64: 1, 128>}, {pipeline_mode = #tpu.pipeline_mode<synchronous>, transform_indices = @transform_4, window_bounds = array<i64: 384, 128>}, {pipeline_mode = #tpu.pipeline_mode<synchronous>, transform_indices = @transform_5, window_bounds = array<i64: 1, 128>}, {transform_indices = @transform_6, window_bounds = array<i64: 1, 16, 128>}]} {
    %c16_i32 = arith.constant 16 : i32
    %0 = arith.muli %arg1, %c16_i32 : i32
    %1 = tpu.assume_multiple %0, 8 : i32
    %c0_i32 = arith.constant 0 : i32
    %2 = arith.addi %1, %c0_i32 : i32
    %c0 = arith.constant 0 : index
    %3 = arith.index_cast %2 : i32 to index
    %c0_0 = arith.constant 0 : index
    %4 = vector.load %arg2[%c0, %3, %c0_0] : memref<1x32x128xf32, #tpu.memory_space<vmem>>, vector<1x24x128xf32>
    %5 = vector.shape_cast %4 : vector<1x24x128xf32> to vector<24x128xf32>
    %c1_i32 = arith.constant 1 : i32
    %6 = arith.addi %1, %c1_i32 : i32
    %c0_1 = arith.constant 0 : index
    %7 = arith.index_cast %6 : i32 to index
    %c0_2 = arith.constant 0 : index
    %8 = vector.load %arg2[%c0_1, %7, %c0_2] : memref<1x32x128xf32, #tpu.memory_space<vmem>>, vector<1x24x128xf32>
    %9 = vector.shape_cast %8 : vector<1x24x128xf32> to vector<24x128xf32>
    %c2_i32 = arith.constant 2 : i32
    %10 = arith.addi %1, %c2_i32 : i32
    %c0_3 = arith.constant 0 : index
    %11 = arith.index_cast %10 : i32 to index
    %c0_4 = arith.constant 0 : index
    %12 = vector.load %arg2[%c0_3, %11, %c0_4] : memref<1x32x128xf32, #tpu.memory_space<vmem>>, vector<1x24x128xf32>
    %13 = vector.shape_cast %12 : vector<1x24x128xf32> to vector<24x128xf32>
    %14 = tpu.concatenate %5, %9, %13 in 1 : vector<24x128xf32>, vector<24x128xf32>, vector<24x128xf32> -> vector<24x384xf32>
    %c0_5 = arith.constant 0 : index
    %c0_6 = arith.constant 0 : index
    %15 = vector.load %arg4[%c0_5, %c0_6] : memref<384x128xf32, #tpu.memory_space<vmem>>, vector<384x128xf32>
    %cst = arith.constant dense<0.000000e+00> : vector<24x128xf32>
    %16 = tpu.matmul %14, %15, %cst {dimension_numbers = #tpu.dot_dimension_numbers<[1], [0], [0], [1], [0, 0, 1, 1], [], []>} : vector<24x384xf32>, vector<384x128xf32>, vector<24x128xf32> -> vector<24x128xf32>
    %c0_7 = arith.constant 0 : index
    %c0_8 = arith.constant 0 : index
    %17 = vector.load %arg5[%c0_7, %c0_8] : memref<1x128xf32, #tpu.memory_space<vmem>>, vector<1x128xf32>
    %18 = vector.broadcast %17 : vector<1x128xf32> to vector<24x128xf32>
    %19 = arith.addf %16, %18 : vector<24x128xf32>
    %cst_9 = arith.constant 1.702000e+00 : f32
    %20 = vector.broadcast %cst_9 : f32 to vector<24x128xf32>
    %21 = arith.mulf %20, %19 : vector<24x128xf32>
    %22 = arith.negf %21 : vector<24x128xf32>
    %23 = math.exp %22 : vector<24x128xf32>
    %cst_10 = arith.constant 1.000000e+00 : f32
    %24 = vector.broadcast %cst_10 : f32 to vector<24x128xf32>
    %25 = arith.addf %24, %23 : vector<24x128xf32>
    %26 = arith.divf %24, %25 : vector<24x128xf32>
    %27 = arith.mulf %19, %26 : vector<24x128xf32>
    %c1_i32_11 = arith.constant 1 : i32
    %28 = arith.addi %1, %c1_i32_11 : i32
    %c0_12 = arith.constant 0 : index
    %29 = arith.index_cast %28 : i32 to index
    %c0_13 = arith.constant 0 : index
    %30 = vector.load %arg3[%c0_12, %29, %c0_13] : memref<1x32x1xf32, #tpu.memory_space<vmem>>, vector<1x24x1xf32>
    %31 = vector.shape_cast %30 : vector<1x24x1xf32> to vector<24x1xf32>
    %32 = vector.broadcast %31 : vector<24x1xf32> to vector<24x128xf32>
    %33 = arith.mulf %27, %32 : vector<24x128xf32>
    %c0_14 = arith.constant 0 : index
    %c0_15 = arith.constant 0 : index
    %34 = vector.load %arg9[%c0_14, %c0_15] : memref<24x128xf32, #tpu.memory_space<vmem>>, vector<24x128xf32>
    tpu.vector_store %arg9[%c0_14, %c0_15], %33 {strides = array<i32>} : memref<24x128xf32, #tpu.memory_space<vmem>>, vector<24x128xf32>,
    %c0_16 = arith.constant 0 : index
    %c0_17 = arith.constant 0 : index
    %35 = vector.load %arg9[%c0_16, %c0_17] : memref<24x128xf32, #tpu.memory_space<vmem>>, vector<16x128xf32>
    %c1 = arith.constant 1 : index
    %c0_18 = arith.constant 0 : index
    %36 = vector.load %arg9[%c1, %c0_18] : memref<24x128xf32, #tpu.memory_space<vmem>>, vector<16x128xf32>
    %c2 = arith.constant 2 : index
    %c0_19 = arith.constant 0 : index
    %37 = vector.load %arg9[%c2, %c0_19] : memref<24x128xf32, #tpu.memory_space<vmem>>, vector<16x128xf32>
    %38 = tpu.concatenate %35, %36, %37 in 1 : vector<16x128xf32>, vector<16x128xf32>, vector<16x128xf32> -> vector<16x384xf32>
    %c0_20 = arith.constant 0 : index
    %c0_21 = arith.constant 0 : index
    %39 = vector.load %arg6[%c0_20, %c0_21] : memref<384x128xf32, #tpu.memory_space<vmem>>, vector<384x128xf32>
    %cst_22 = arith.constant dense<0.000000e+00> : vector<16x128xf32>
    %40 = tpu.matmul %38, %39, %cst_22 {dimension_numbers = #tpu.dot_dimension_numbers<[1], [0], [0], [1], [0, 0, 1, 1], [], []>} : vector<16x384xf32>, vector<384x128xf32>, vector<16x128xf32> -> vector<16x128xf32>
    %c0_23 = arith.constant 0 : index
    %c0_24 = arith.constant 0 : index
    %41 = vector.load %arg7[%c0_23, %c0_24] : memref<1x128xf32, #tpu.memory_space<vmem>>, vector<1x128xf32>
    %42 = vector.broadcast %41 : vector<1x128xf32> to vector<16x128xf32>
    %43 = arith.addf %40, %42 : vector<16x128xf32>
    %c2_i32_25 = arith.constant 2 : i32
    %44 = arith.addi %1, %c2_i32_25 : i32
    %c0_26 = arith.constant 0 : index
    %45 = arith.index_cast %44 : i32 to index
    %c0_27 = arith.constant 0 : index
    %46 = vector.load %arg3[%c0_26, %45, %c0_27] : memref<1x32x1xf32, #tpu.memory_space<vmem>>, vector<1x16x1xf32>
    %47 = vector.shape_cast %46 : vector<1x16x1xf32> to vector<16x1xf32>
    %48 = vector.broadcast %47 : vector<16x1xf32> to vector<16x128xf32>
    %49 = arith.mulf %43, %48 : vector<16x128xf32>
    %c0_28 = arith.constant 0 : index
    %c0_29 = arith.constant 0 : index
    %c0_30 = arith.constant 0 : index
    %50 = vector.load %arg8[%c0_28, %c0_29, %c0_30] : memref<1x16x128xf32, #tpu.memory_space<vmem>>, vector<1x16x128xf32>
    %51 = vector.shape_cast %50 : vector<1x16x128xf32> to vector<16x128xf32>
    %52 = vector.shape_cast %49 : vector<16x128xf32> to vector<1x16x128xf32>
    tpu.vector_store %arg8[%c0_28, %c0_29, %c0_30], %52 {strides = array<i32>} : memref<1x16x128xf32, #tpu.memory_space<vmem>>, vector<1x16x128xf32>,
    return
  }
  func.func @transform_0(%arg0: i32, %arg1: i32) -> (i32, i32, i32) {
    %c0_i32 = arith.constant 0 : i32
    %c0_i32_0 = arith.constant 0 : i32
    %c0_i32_1 = arith.constant 0 : i32
    return %arg0, %c0_i32, %c0_i32_0 : i32, i32, i32
  }
  func.func @transform_1(%arg0: i32, %arg1: i32) -> (i32, i32, i32) {
    %c0_i32 = arith.constant 0 : i32
    %c0_i32_0 = arith.constant 0 : i32
    %c0_i32_1 = arith.constant 0 : i32
    return %arg0, %c0_i32, %c0_i32_0 : i32, i32, i32
  }
  func.func @transform_2(%arg0: i32, %arg1: i32) -> (i32, i32) {
    %c0_i32 = arith.constant 0 : i32
    %c0_i32_0 = arith.constant 0 : i32
    %c0_i32_1 = arith.constant 0 : i32
    return %c0_i32, %c0_i32_0 : i32, i32
  }
  func.func @transform_3(%arg0: i32, %arg1: i32) -> (i32, i32) {
    %c0_i32 = arith.constant 0 : i32
    %c0_i32_0 = arith.constant 0 : i32
    %c0_i32_1 = arith.constant 0 : i32
    return %c0_i32, %c0_i32_0 : i32, i32
  }
  func.func @transform_4(%arg0: i32, %arg1: i32) -> (i32, i32) {
    %c0_i32 = arith.constant 0 : i32
    %c0_i32_0 = arith.constant 0 : i32
    %c0_i32_1 = arith.constant 0 : i32
    return %c0_i32, %c0_i32_0 : i32, i32
  }
  func.func @transform_5(%arg0: i32, %arg1: i32) -> (i32, i32) {
    %c0_i32 = arith.constant 0 : i32
    %c0_i32_0 = arith.constant 0 : i32
    %c0_i32_1 = arith.constant 0 : i32
    return %c0_i32, %c0_i32_0 : i32, i32
  }
  func.func @transform_6(%arg0: i32, %arg1: i32) -> (i32, i32, i32) {
    %c0_i32 = arith.constant 0 : i32
    %c0_i32_0 = arith.constant 0 : i32
    return %arg0, %arg1, %c0_i32 : i32, i32, i32
  }
}

</mosaic_0001>

<bundles_post_ra>
// kernel: tpu_custom_call.1
= control target key start
LH: loop header
LB: loop body
LE: loop exit
PB: predicated region body
PF: predicated region fallthrough
CT: control target
= control target key end

     0   :  { %11 = vsyncpa [#allocation4], 0  ;;  %s1367_s0 = inlined_call_operand.vmem [shape: f32[2,32,128], index: 0, kind: input, shape index: {}]   ;;  %s1368_s1 = inlined_call_operand.vmem [shape: f32[2,32,1], index: 1, kind: input, shape index: {}]   ;;  %s1369_s2 = inlined_call_operand.hbm [shape: f32[384,128], index: 2, kind: input, shape index: {}]   ;;  %s1370_s3 = inlined_call_operand.vmem [shape: f32[1,128], index: 3, kind: input, shape index: {}]   ;;  %s1371_s4 = inlined_call_operand.hbm [shape: f32[384,128], index: 4, kind: input, shape index: {}]   ;;  %s1372_s5 = inlined_call_operand.vmem [shape: f32[1,128], index: 5, kind: input, shape index: {}]   ;;  %s1373_s6 = inlined_call_operand.hbm [shape: f32[2,16,128], index: 6, kind: output, shape index: {}]  }
   0x1   :  { %12 = vsyncpa [#allocation7], 0 }
   0x2   :  { %13 = vsyncpa [#allocation5], 0 }
   0x3   :  { %15 = vsyncpa [#allocation5 + $0x1], 0  ;;  %s1191_s21 = smov 0   ;;  %s1193_s22 = smov 0  }
   0x4   :  { %s1195_s23 = smov 0   ;;  %s1197_s24 = smov 0  }
   0x5   :  { %s1199_s25 = smov 0   ;;  %s1201_s26 = smov 0  }
   0x6 LB: > { %s835_s27 = sadd.s32 4294967295, %s1147_s26   ;;  %s836_s28 = sadd.s32 4294967294, %s1147_s26   ;;  %s1147_s26 = sphi %s1201_s26, %s21_s26   ;;  %s1143_s25 = sphi %s1199_s25, %s1382_s25   ;;  %s1139_s24 = sphi %s1197_s24, %s1381_s24   ;;  %s1135_s23 = sphi %s1195_s23, %s1380_s23   ;;  %s1131_s22 = sphi %s1193_s22, %s1379_s22   ;;  %s1127_s21 = sphi %s1191_s21, %s1378_s21  }
   0x7   : > { %s33_s29 = sadd.s32 1, %s1143_s25  ;;  %s178_s30 = sadd.s32 1, %s1135_s23 }
   0x8   : > { %p35_p0 = scmp.ge.s32.totalorder %s33_s29, 2  ;;  %p188_p1 = scmp.ne.s32.totalorder %s1135_s23, %s1131_s22 }
   0x9   : > { %p189_p2 = scmp.eq.s32.totalorder %s835_s27, 1  ;;  %p194_p3 = scmp.ne.s32.totalorder %s1131_s22, %s1127_s21 }
   0xa   : > { %s1384_s29 = smov (%p35_p0, %s33_s29), 0  ;;  %p195_p5 = scmp.eq.s32.totalorder %s836_s28, 1 }
   0xb   : > { %p1231_p4 = por %p189_p2, %p188_p1  ;;  %s173_s8 = ssub.s32 %s1143_s25, %s1384_s29 }
   0xc   : > { %p837_p6 = scmp.ge.s32.totalorder %s1147_s26, 1  ;;  %p176_p7 = scmp.eq.s32.totalorder %s173_s8, 0 }
   0xd   : > { %p1238_p8 = por %p195_p5, %p194_p3  ;;  %p202_p9 = scmp.lt.s32.totalorder %s1147_s26, 3 }
   0xe   : > { %s1244_s10 = scalar_select %p176_p7, %s1135_s23, %s178_s30  }
   0xf   : > { %p1246_p10 = pnand %p837_p6, %p202_p9  ;;  %p1250_p11 = scmp.eq.s32.totalorder %s835_s27, 0 }
  0x10   : > { %s213_s15 = sshll.u32 %s1369_s2, 4  ;;  %s1149_s16 = smov [#allocation3]   ;;  %s214_s15 = int_to_ptr.hbm [resolvable:$true] %s213_s15 }
  0x11   : > { %p913_p12 = pneg %p1246_p10  ;;  %s215_s17 = sshll.u32 %s1149_s16, 4  ;;  %s216_s17 = int_to_ptr.vmem [resolvable:$true] %s215_s17 }
  0x12   : > { %s230_s20 = sshll.u32 %s1371_s4, 4  ;;  %s1150_s27 = smov 128   ;;  %s231_s20 = int_to_ptr.hbm [resolvable:$true] %s230_s20 }
  0x13   : > { %p914_p13 = pnand %p1250_p11, %p913_p12  ;;  %s1151_s28 = smov 8  }
  0x14   : > { %s1152_s30 = smov [#allocation6]   ;;  %267 = sbr.rel (%p1246_p10) target bundleno = 394 (0x18a), region = 44 }
  0x15   : > { %916 = dma.hbm_to_vmem [thread:$0]  (!%p914_p13), %s214_s15, 6144, %s216_s17, [#allocation4], %s1150_s27, %s1150_s27, %s1151_s28  }
  0x16   : > { %s232_s8 = sshll.u32 %s1152_s30, 4  ;;  %s233_s8 = int_to_ptr.vmem [resolvable:$true] %s232_s8 }
  0x17   : > { %919 = dma.hbm_to_vmem [thread:$0]  (!%p914_p13), %s231_s20, 6144, %s233_s8, [#allocation7], %s1150_s27, %s1150_s27, %s1151_s28  }
  0x19   : > { %1114 = dma.done.wait (%p1250_p11), [#allocation4], 6144  }
  0x1a   : > { %1116 = vsyncadd (%p1250_p11), [#allocation4], 4294961152 }
  0x1b   : > { %1118 = dma.done.wait (%p1250_p11), [#allocation7], 6144  }
  0x1c   : > { %1120 = vsyncadd (%p1250_p11), [#allocation7], 4294961152  ;;  %v381_v0 = vld [vmem:[#allocation3 + $0x178] sm:$0xff]  ;;  %v380_v2 = vld [vmem:[#allocation3 + $0x170] sm:$0xff]  ;;  %p308_p0 = scmp.lt.s32.totalorder %s1139_s24, 1  ;;  %v1153_v36 = vmov 0  }
  0x1d   : > { %v349_v1 = vld [vmem:[#allocation3 + $0x78] sm:$0xff]  ;;  %438 = vmatpush.msra.mxu2 %v381_v0  ;;  %v348_v3 = vld [vmem:[#allocation3 + $0x70] sm:$0xff]  ;;  %v379_v5 = vld [vmem:[#allocation3 + $0x168] sm:$0xff]  ;;  %984 = vset.pattern.permute.xlu0 %v1153_v36  ;;  %s305_s30 = sand.u32 1, %s1131_s22   ;;  %s1081_s28 = scalar_lea.hbm %s1373_s6, 32 }
  0x1e   : > { %386 = vmatpush.msra.mxu0 %v349_v1  ;;  %v365_v4 = vld [vmem:[#allocation3 + $0xf8] sm:$0xff]  ;;  %v347_v6 = vld [vmem:[#allocation3 + $0x68] sm:$0xff]  ;;  %v364_v7 = vld [vmem:[#allocation3 + $0xf0] sm:$0xff]  ;;  %s1276_s11 = scalar_select %p308_p0, %s1139_s24, 1  ;;  %985 = vset.pattern.permute.xlu1 %v1153_v36 }
  0x1f   : > { %412 = vmatpush.msra.mxu1 %v365_v4  ;;  %439 = vmatpush.msra.mxu2 %v380_v2  ;;  %v363_v8 = vld [vmem:[#allocation3 + $0xe8] sm:$0xff]  ;;  %v378_v9 = vld [vmem:[#allocation3 + $0x160] sm:$0xff]  ;;  %v377_v12 = vld [vmem:[#allocation3 + $0x158] sm:$0xff]  ;;  %s844_s8 = sshll.u32 %s305_s30, 4 }
  0x20   : > { %387 = vmatpush.msra.mxu0 %v348_v3  ;;  %v346_v10 = vld [vmem:[#allocation3 + $0x60] sm:$0xff]  ;;  %v345_v13 = vld [vmem:[#allocation3 + $0x58] sm:$0xff]  ;;  %v376_v15 = vld [vmem:[#allocation3 + $0x150] sm:$0xff]  ;;  %s868_s12 = sshll.u32 %s1276_s11, 5  ;;  %986 = vset.pattern.permute.xlu2 %v1153_v36  ;;  %s307_s11 = scalar_lea.vmem [#allocation8], %s844_s8 }
  0x21   : > { %413 = vmatpush.msra.mxu1 %v364_v7  ;;  %440 = vmatpush.msra.mxu2 %v379_v5  ;;  %v362_v11 = vld [vmem:[#allocation3 + $0xe0] sm:$0xff]  ;;  %v361_v14 = vld [vmem:[#allocation3 + $0xd8] sm:$0xff]  ;;  %v344_v16 = vld [vmem:[#allocation3 + $0x50] sm:$0xff]  ;;  %s1284_s15 = scalar_lea.vmem %s1368_s1, %s868_s12  ;;  %s1293_s18 = scalar_lea.vmem %s1367_s0, %s868_s12 }
  0x22   : > { %388 = vmatpush.msra.mxu0 %v347_v6  ;;  %v360_v17 = vld [vmem:[#allocation3 + $0xd0] sm:$0xff]  ;;  %v375_v18 = vld [vmem:[#allocation3 + $0x148] sm:$0xff]  ;;  %v374_v21 = vld [vmem:[#allocation3 + $0x140] sm:$0xff]  ;;  %s870_s12 = sshll.u32 %s1139_s24, 4  ;;  %s711_s16 = sshll.u32 %s307_s11, 4  ;;  %s712_s16 = int_to_ptr.vmem [resolvable:$true] %s711_s16 }
  0x23   : > { %414 = vmatpush.msra.mxu1 %v363_v8  ;;  %441 = vmatpush.msra.mxu2 %v378_v9  ;;  %v343_v19 = vld [vmem:[#allocation3 + $0x48] sm:$0xff]  ;;  %v342_v22 = vld [vmem:[#allocation3 + $0x40] sm:$0xff]  ;;  %v373_v24 = vld [vmem:[#allocation3 + $0x138] sm:$0xff] }
  0x24   : > { %389 = vmatpush.msra.mxu0 %v346_v10  ;;  %v359_v20 = vld [vmem:[#allocation3 + $0xc8] sm:$0xff]  ;;  %v358_v23 = vld [vmem:[#allocation3 + $0xc0] sm:$0xff]  ;;  %v341_v25 = vld [vmem:[#allocation3 + $0x38] sm:$0xff] }
  0x25   : > { %415 = vmatpush.msra.mxu1 %v362_v11  ;;  %442 = vmatpush.msra.mxu2 %v377_v12  ;;  %v357_v26 = vld [vmem:[#allocation3 + $0xb8] sm:$0xff]  ;;  %v372_v27 = vld [vmem:[#allocation3 + $0x130] sm:$0xff]  ;;  %v371_v30 = vld [vmem:[#allocation3 + $0x128] sm:$0xff] }
  0x26   : > { %390 = vmatpush.msra.mxu0 %v345_v13  ;;  %v340_v28 = vld [vmem:[#allocation3 + $0x30] sm:$0xff]  ;;  %v339_v31 = vld [vmem:[#allocation3 + $0x28] sm:$0xff]  ;;  %v370_v34 = vld [vmem:[#allocation3 + $0x120] sm:$0xff] }
  0x27   : > { %416 = vmatpush.msra.mxu1 %v361_v14  ;;  %443 = vmatpush.msra.mxu2 %v376_v15  ;;  %v356_v29 = vld [vmem:[#allocation3 + $0xb0] sm:$0xff]  ;;  %v355_v32 = vld [vmem:[#allocation3 + $0xa8] sm:$0xff]  ;;  %v338_v35 = vld [vmem:[#allocation3 + $0x20] sm:$0xff] }
  0x28   : > { %391 = vmatpush.msra.mxu0 %v344_v16  ;;  %v858_v33 = vld [vmem:[%s1284_s15 + $0x1] sm:$0xff]  ;;  %v354_v37 = vld [vmem:[#allocation3 + $0xa0] sm:$0xff]  ;;  %v369_v38 = vld [vmem:[#allocation3 + $0x118] sm:$0xff] }
  0x29   : > { %417 = vmatpush.msra.mxu1 %v360_v17  ;;  %444 = vmatpush.msra.mxu2 %v375_v18  ;;  %v337_v39 = vld [vmem:[#allocation3 + $0x18] sm:$0xff]  ;;  %v368_v42 = vld [vmem:[#allocation3 + $0x110] sm:$0xff]  ;;  %v367_v45 = vld [vmem:[#allocation3 + $0x108] sm:$0xff] }
  0x2a   : > { %392 = vmatpush.msra.mxu0 %v343_v19  ;;  %533 = vperm.xlu0 %984, %v858_v33   ;;  %v353_v40 = vld [vmem:[#allocation3 + $0x98] sm:$0xff]  ;;  %v336_v43 = vld [vmem:[#allocation3 + $0x10] sm:$0xff]  ;;  %v335_v46 = vld [vmem:[#allocation3 + $0x8] sm:$0xff] }
  0x2b   : > { %418 = vmatpush.msra.mxu1 %v359_v20  ;;  %445 = vmatpush.msra.mxu2 %v374_v21  ;;  %v860_v41 = vld [vmem:[%s1284_s15 + $0x11] sm:$0xff]  ;;  %v352_v44 = vld [vmem:[#allocation3 + $0x90] sm:$0xff]  ;;  %v351_v47 = vld [vmem:[#allocation3 + $0x88] sm:$0xff] }
  0x2c   : > { %393 = vmatpush.msra.mxu0 %v342_v22  ;;  %543 = vperm.xlu1 %985, %v860_v41   ;;  %v859_v48 = vld [vmem:[%s1284_s15 + $0x9] sm:$0xff]  ;;  %v366_v49 = vld [vmem:[#allocation3 + $0x100] sm:$0xff]  ;;  %v321_v52 = vld [vmem:[%s1293_s18] sm:$0xff] }
  0x2d   : > { %419 = vmatpush.msra.mxu1 %v358_v23  ;;  %446 = vmatpush.msra.mxu2 %v373_v24  ;;  %v334_v50 = vld [vmem:[#allocation3] sm:$0xff]  ;;  %v852_v51 = vld [vmem:[%s1293_s18 + $0x2] sm:$0xff]  ;;  %v853_v56 = vld [vmem:[%s1293_s18 + $0xa] sm:$0xff] }
  0x2e   : > { %394 = vmatpush.msra.mxu0 %v341_v25  ;;  %v350_v53 = vld [vmem:[#allocation3 + $0x80] sm:$0xff]  ;;  %v849_v54 = vld [vmem:[%s1293_s18 + $0x1] sm:$0xff]  ;;  %v850_v58 = vld [vmem:[%s1293_s18 + $0x9] sm:$0xff] }
  0x2f   : > { %420 = vmatpush.msra.mxu1 %v357_v26  ;;  %447 = vmatpush.msra.mxu2 %v372_v27  ;;  %v861_v55 = vld [vmem:[%s1284_s15 + $0x2] sm:$0xff]  ;;  %v854_v59 = vld [vmem:[%s1293_s18 + $0x12] sm:$0xff]  ;;  %v1309_v13 = vld [vmem:[%s1370_s3] ss:$0 sm:$0xff] }
  0x30   : > { %395 = vmatpush.msra.mxu0 %v340_v28  ;;  %v322_v57 = vld [vmem:[%s1293_s18 + $0x8] sm:$0xff]  ;;  %v323_v60 = vld [vmem:[%s1293_s18 + $0x10] sm:$0xff]  ;;  %v571_v0 = vld [vmem:[#allocation6 + $0x68] sm:$0xff] }
  0x31   : > { %421 = vmatpush.msra.mxu1 %v356_v29  ;;  %448 = vmatpush.msra.mxu2 %v371_v30  ;;  %v851_v61 = vld [vmem:[%s1293_s18 + $0x11] sm:$0xff]  ;;  %v572_v63 = vld [vmem:[#allocation6 + $0x70] sm:$0xff]  ;;  %v567_v4 = vld [vmem:[#allocation6 + $0x48] sm:$0xff]  ;;  %s697_s18 = scalar_lea.sflag [#allocation5], %s305_s30 }
  0x32   : > { %396 = vmatpush.msra.mxu0 %v339_v31  ;;  %538 = vperm.xlu0 %984, %v859_v48   ;;  %v573_v62 = vld [vmem:[#allocation6 + $0x78] sm:$0xff]  ;;  %v570_v1 = vld [vmem:[#allocation6 + $0x60] sm:$0xff]  ;;  %v568_v3 = vld [vmem:[#allocation6 + $0x50] sm:$0xff] }
  0x33   : > { %422 = vmatpush.msra.mxu1 %v355_v32  ;;  %449 = vmatpush.msra.mxu2 %v370_v34  ;;  %v569_v2 = vld [vmem:[#allocation6 + $0x58] sm:$0xff]  ;;  %v566_v5 = vld [vmem:[#allocation6 + $0x40] sm:$0xff]  ;;  %v564_v7 = vld [vmem:[#allocation6 + $0x30] sm:$0xff] }
  0x34   : > { %397 = vmatpush.msra.mxu0 %v338_v35  ;;  %684 = vperm.xlu1 %985, %v861_v55   ;;  %v565_v6 = vld [vmem:[#allocation6 + $0x38] sm:$0xff]  ;;  %v563_v8 = vld [vmem:[#allocation6 + $0x28] sm:$0xff]  ;;  %v562_v9 = vld [vmem:[#allocation6 + $0x20] sm:$0xff] }
  0x35   : > { %423 = vmatpush.msra.mxu1 %v354_v37  ;;  %450 = vmatpush.msra.mxu2 %v369_v38  ;;  %v589_v10 = vld [vmem:[#allocation6 + $0xf8] sm:$0xff]  ;;  %v588_v14 = vld [vmem:[#allocation6 + $0xf0] sm:$0xff]  ;;  %v587_v17 = vld [vmem:[#allocation6 + $0xe8] sm:$0xff] }
  0x36   : > { %398 = vmatpush.msra.mxu0 %v337_v39  ;;  %610 = vmatpush.msra.mxu3 %v573_v62  ;;  %v605_v11 = vld [vmem:[#allocation6 + $0x178] sm:$0xff]  ;;  %v604_v15 = vld [vmem:[#allocation6 + $0x170] sm:$0xff]  ;;  %v603_v18 = vld [vmem:[#allocation6 + $0x168] sm:$0xff] }
  0x37   : > { %424 = vmatpush.msra.mxu1 %v353_v40  ;;  %451 = vmatpush.msra.mxu2 %v368_v42  ;;  %v561_v12 = vld [vmem:[#allocation6 + $0x18] sm:$0xff]  ;;  %v560_v16 = vld [vmem:[#allocation6 + $0x10] sm:$0xff]  ;;  %v559_v20 = vld [vmem:[#allocation6 + $0x8] sm:$0xff] }
  0x38   : > { %399 = vmatpush.msra.mxu0 %v336_v43  ;;  %611 = vmatpush.msra.mxu3 %v572_v63  ;;  %v586_v22 = vld [vmem:[#allocation6 + $0xe0] sm:$0xff]  ;;  %v585_v27 = vld [vmem:[#allocation6 + $0xd8] sm:$0xff]  ;;  %v584_v29 = vld [vmem:[#allocation6 + $0xd0] sm:$0xff] }
  0x39   : > { %425 = vmatpush.msra.mxu1 %v352_v44  ;;  %452 = vmatpush.msra.mxu2 %v367_v45  ;;  %v602_v23 = vld [vmem:[#allocation6 + $0x160] sm:$0xff]  ;;  %v601_v28 = vld [vmem:[#allocation6 + $0x158] sm:$0xff]  ;;  %v600_v30 = vld [vmem:[#allocation6 + $0x150] sm:$0xff] }
  0x3a   : > { %400 = vmatpush.msra.mxu0 %v335_v46  ;;  %612 = vmatpush.msra.mxu3 %v571_v0  ;;  %v558_v25 = vld [vmem:[#allocation6] sm:$0xff]  ;;  %v583_v33 = vld [vmem:[#allocation6 + $0xc8] sm:$0xff]  ;;  %v581_v43 = vld [vmem:[#allocation6 + $0xb8] sm:$0xff] }
  0x3b   : > { %426 = vmatpush.msra.mxu1 %v351_v47  ;;  %453 = vmatpush.msra.mxu2 %v366_v49  ;;  %v599_v34 = vld [vmem:[#allocation6 + $0x148] sm:$0xff]  ;;  %v582_v38 = vld [vmem:[#allocation6 + $0xc0] sm:$0xff]  ;;  %v597_v44 = vld [vmem:[#allocation6 + $0x138] sm:$0xff] }
  0x3c   : > { %401 = vmatpush.msra.mxu0 %v334_v50  ;;  %454 = vmatmul.f32.vlgmr.msra.gmra.mxu2 %v852_v51  ;;  %v598_v39 = vld [vmem:[#allocation6 + $0x140] sm:$0xff]  ;;  %v580_v45 = vld [vmem:[#allocation6 + $0xb0] sm:$0xff]  ;;  %v579_v50 = vld [vmem:[#allocation6 + $0xa8] sm:$0xff] }
  0x3d   : > { %402 = vmatmul.f32.vlgmr.msra.gmra.mxu0 %v321_v52  ;;  %427 = vmatpush.msra.mxu1 %v350_v53  ;;  %v596_v46 = vld [vmem:[#allocation6 + $0x130] sm:$0xff]  ;;  %v595_v51 = vld [vmem:[#allocation6 + $0x128] sm:$0xff]  ;;  %v578_v55 = vld [vmem:[#allocation6 + $0xa0] sm:$0xff] }
  0x3e   : > { %428 = vmatmul.f32.vlgmr.msra.gmra.mxu1 %v849_v54  ;;  %613 = vmatpush.msra.mxu3 %v570_v1  ;;  %v593_v62 = vld [vmem:[#allocation6 + $0x118] sm:$0xff]  ;;  %v576_v0 = vld [vmem:[#allocation6 + $0x90] sm:$0xff] }
  0x3f   : > { %633 = vmatpush.msrb.mxu0 %v589_v10  ;;  %656 = vmatpush.msrb.mxu1 %v605_v11  ;;  %v592_v1 = vld [vmem:[#allocation6 + $0x110] sm:$0xff] }
  0x40   : > { %614 = vmatpush.msra.mxu3 %v569_v2  ;;  %887 = vmatpush.msrb.mxu2 %v605_v11 }
  0x41   : > { %634 = vmatpush.msrb.mxu0 %v588_v14  ;;  %657 = vmatpush.msrb.mxu1 %v604_v15 }
  0x42   : > { %615 = vmatpush.msra.mxu3 %v568_v3  ;;  %888 = vmatpush.msrb.mxu2 %v604_v15  ;;  %v575_v3 = vld [vmem:[#allocation6 + $0x88] sm:$0xff] }
  0x43   : > { %635 = vmatpush.msrb.mxu0 %v587_v17  ;;  %658 = vmatpush.msrb.mxu1 %v603_v18 }
  0x44   : > { %457 = vmatmul.f32.gmra.mxu2 %v853_v56  ;;  %616 = vmatpush.msra.mxu3 %v567_v4  ;;  %v594_v56 = vld [vmem:[#allocation6 + $0x120] sm:$0xff]  ;;  %v591_v4 = vld [vmem:[#allocation6 + $0x108] sm:$0xff] }
  0x45   : > { %405 = vmatmul.f32.gmra.mxu0 %v322_v57  ;;  %889 = vmatpush.msrb.mxu2 %v603_v18 }
  0x46   : > { %431 = vmatmul.f32.gmra.mxu1 %v850_v58  ;;  %617 = vmatpush.msra.mxu3 %v566_v5 }
  0x47   : > { %636 = vmatpush.msrb.mxu0 %v586_v22  ;;  %659 = vmatpush.msrb.mxu1 %v602_v23 }
  0x48   : > { %618 = vmatpush.msra.mxu3 %v565_v6  ;;  %890 = vmatpush.msrb.mxu2 %v602_v23  ;;  %v574_v6 = vld [vmem:[#allocation6 + $0x80] sm:$0xff] }
  0x49   : > { %637 = vmatpush.msrb.mxu0 %v585_v27  ;;  %660 = vmatpush.msrb.mxu1 %v601_v28 }
  0x4a   : > { %619 = vmatpush.msra.mxu3 %v564_v7  ;;  %891 = vmatpush.msrb.mxu2 %v601_v28  ;;  %v590_v7 = vld [vmem:[#allocation6 + $0x100] sm:$0xff] }
  0x4b   : > { %638 = vmatpush.msrb.mxu0 %v584_v29  ;;  %661 = vmatpush.msrb.mxu1 %v600_v30 }
  0x4c   : > { %460 = vmatmul.f32.gmra.mxu2 %v854_v59  ;;  %620 = vmatpush.msra.mxu3 %v563_v8 }
  0x4d   : > { %408 = vmatmul.f32.gmra.mxu0 %v323_v60  ;;  %892 = vmatpush.msrb.mxu2 %v600_v30 }
  0x4e   : > { %434 = vmatmul.f32.gmra.mxu1 %v851_v61  ;;  %621 = vmatpush.msra.mxu3 %v562_v9  ;;  %v577_v61 = vld [vmem:[#allocation6 + $0x98] sm:$0xff] }
  0x4f   : > { %639 = vmatpush.msrb.mxu0 %v583_v33  ;;  %662 = vmatpush.msrb.mxu1 %v599_v34 }
  0x50   : > { %622 = vmatpush.msra.mxu3 %v561_v12  ;;  %893 = vmatpush.msrb.mxu2 %v599_v34 }
  0x51   : > { %640 = vmatpush.msrb.mxu0 %v582_v38  ;;  %663 = vmatpush.msrb.mxu1 %v598_v39 }
  0x52   : > { %623 = vmatpush.msra.mxu3 %v560_v16  ;;  %894 = vmatpush.msrb.mxu2 %v598_v39 }
  0x53   : > { %641 = vmatpush.msrb.mxu0 %v581_v43  ;;  %664 = vmatpush.msrb.mxu1 %v597_v44 }
  0x54   : > { %624 = vmatpush.msra.mxu3 %v559_v20  ;;  %895 = vmatpush.msrb.mxu2 %v597_v44 }
  0x55   : > { %642 = vmatpush.msrb.mxu0 %v580_v45  ;;  %665 = vmatpush.msrb.mxu1 %v596_v46 }
  0x56   : > { %625 = vmatpush.msra.mxu3 %v558_v25  ;;  %896 = vmatpush.msrb.mxu2 %v596_v46 }
  0x57   : > { %643 = vmatpush.msrb.mxu0 %v579_v50  ;;  %666 = vmatpush.msrb.mxu1 %v595_v51 }
  0x58   : > { %871 = vmatpush.msrb.mxu3 %v589_v10  ;;  %897 = vmatpush.msrb.mxu2 %v595_v51 }
  0x59   : > { %644 = vmatpush.msrb.mxu0 %v578_v55  ;;  %667 = vmatpush.msrb.mxu1 %v594_v56 }
  0x5a   : > { %872 = vmatpush.msrb.mxu3 %v588_v14  ;;  %898 = vmatpush.msrb.mxu2 %v594_v56 }
  0x5b   : > { %645 = vmatpush.msrb.mxu0 %v577_v61  ;;  %668 = vmatpush.msrb.mxu1 %v593_v62 }
  0x5c   : > { %873 = vmatpush.msrb.mxu3 %v587_v17  ;;  %899 = vmatpush.msrb.mxu2 %v593_v62 }
  0x5d   : > { %646 = vmatpush.msrb.mxu0 %v576_v0  ;;  %669 = vmatpush.msrb.mxu1 %v592_v1 }
  0x5e   : > { %874 = vmatpush.msrb.mxu3 %v586_v22  ;;  %900 = vmatpush.msrb.mxu2 %v592_v1 }
  0x5f   : > { %647 = vmatpush.msrb.mxu0 %v575_v3  ;;  %670 = vmatpush.msrb.mxu1 %v591_v4 }
  0x60   : > { %875 = vmatpush.msrb.mxu3 %v585_v27  ;;  %901 = vmatpush.msrb.mxu2 %v591_v4 }
  0x61   : > { %648 = vmatpush.msrb.mxu0 %v574_v6  ;;  %671 = vmatpush.msrb.mxu1 %v590_v7 }
  0x62   : > { %876 = vmatpush.msrb.mxu3 %v584_v29  ;;  %902 = vmatpush.msrb.mxu2 %v590_v7 }
  0x64   : > { %877 = vmatpush.msrb.mxu3 %v583_v33 }
  0x66   : > { %878 = vmatpush.msrb.mxu3 %v582_v38 }
  0x68   : > { %879 = vmatpush.msrb.mxu3 %v581_v43 }
  0x6a   : > { %880 = vmatpush.msrb.mxu3 %v580_v45 }
  0x6c   : > { %881 = vmatpush.msrb.mxu3 %v579_v50 }
  0x6e   : > { %882 = vmatpush.msrb.mxu3 %v578_v55 }
  0x70   : > { %883 = vmatpush.msrb.mxu3 %v577_v61 }
  0x72   : > { %884 = vmatpush.msrb.mxu3 %v576_v0 }
  0x74   : > { %885 = vmatpush.msrb.mxu3 %v575_v3 }
  0x76   : > { %886 = vmatpush.msrb.mxu3 %v574_v6 }
  0x9c   : > { %v534_v22 = vpop.permute.xlu0 %533 }
  0xa4   : > { %v539_v39 = vpop.permute.xlu0 %538 }
  0xba   : > { %v403_v19 = vpop.f32.mrf.mxu0 }
  0xbb   : > { %v404_v21 = vadd.f32 %v1309_v13, %v403_v19  ;;  %v429_v24 = vpop.f32.mrf.mxu1  ;;  %v862_v19 = vld [vmem:[%s1284_s15 + $0xa] sm:$0xff]  ;;  %s710_s15 = scalar_lea.hbm %s1373_s6, %s870_s12 }
  0xbc   : > { %689 = vperm.xlu2 %986, %v862_v19   ;;  %s713_s17 = sshll.u32 %s710_s15, 4  ;;  %s714_s17 = int_to_ptr.hbm [resolvable:$true] %s713_s17 }
  0xbd   : > { %v430_v26 = vadd.f32 %v429_v24, %v404_v21  ;;  %s1075_s19 = sshra.s32 %s714_s17, 4  ;;  %s1076_s19 = int_to_ptr.hbm [resolvable:$true] %s1075_s19 }
  0xbe   : > { %s1077_s24 = scalar_lea.hbm %s1076_s19, 16  ;;  %p1082_p5 = scmp.lt.s32.totalorder %s1076_s19, %s1373_s6 }
  0xbf   : > { %v455_v31 = vpop.f32.mrf.mxu2  ;;  %p1078_p1 = scmp.ne.s32.totalorder %s1076_s19, %s1077_s24  ;;  %p1083_p6 = scmp.lt.s32.totalorder %s1081_s28, %s1077_s24 }
  0xc0   : > { %v1312_v32 = vadd.f32 %v455_v31, %v430_v26 }
  0xc1   : > { %p1079_p2 = pnand %p1078_p1, %p1231_p4  ;;  %p1084_p7 = por %p1083_p6, %p1082_p5 }
  0xc2   : > { %v406_v35 = vpop.f32.mrf.mxu0  ;;  %v855_v36 = vmul.f32 -1.702, %v1312_v32 }
  0xc3   : > { %v407_v37 = vadd.f32 %v1309_v13, %v406_v35  ;;  %v432_v40 = vpop.f32.mrf.mxu1  ;;  %p1080_p3 = pneg %p1079_p2 }
  0xc4   : > { %v470_v41 = vmul.f32 1.442695, %v855_v36 }
  0xc5   : > { %v433_v42 = vadd.f32 %v432_v40, %v407_v37  ;;  %p1085_p9 = pnand %p1084_p7, %p1080_p3 }
  0xc6   : > { %989 = vpow2.f32 %v470_v41 }
  0xc7   : > { %v458_v47 = vpop.f32.mrf.mxu2 }
  0xc8   : > { %v1316_v48 = vadd.f32 %v458_v47, %v433_v42 }
  0xca   : > { %v409_v49 = vpop.f32.mrf.mxu0  ;;  %v856_v52 = vmul.f32 -1.702, %v1316_v48 }
  0xcb   : > { %v410_v53 = vadd.f32 %v1309_v13, %v409_v49  ;;  %v435_v54 = vpop.f32.mrf.mxu1 }
  0xcc   : > { %v990_v57 = vpop.eup %989  ;;  %v472_v58 = vmul.f32 1.442695, %v856_v52  ;;  %v544_v52 = vpop.permute.xlu1 %543 }
  0xcd   : > { %v436_v59 = vadd.f32 %v435_v54, %v410_v53  ;;  %v476_v60 = vadd.f32 1.0, %v990_v57  ;;  %v988_v57 = vld [vmem:[%s1372_s5] ss:$0 sm:$0xff] }
  0xce   : > { %991 = vpow2.f32 %v472_v58 }
  0xcf   : > { %993 = vrcp.f32 %v476_v60  ;;  %v461_v63 = vpop.f32.mrf.mxu2  ;;  %v490_v14 = vand.u32 2147483648, %v476_v60  ;;  %v488_v16 = vand.u32 2147483647, %v476_v60  ;;  %vm484_vm1 = vweird.f32 %v476_v60 }
  0xd0   : > { %v1320_v2 = vadd.f32 %v461_v63, %v436_v59 }
  0xd1   : > { %v491_v23 = vor.u32 1.1754944e-38, %v490_v14  ;;  %vm489_vm3 = vcmp.eq.f32.partialorder %v488_v16, 8.507059e+37 }
  0xd2   : > { %v857_v5 = vmul.f32 -1.702, %v1320_v2 }
  0xd4   : > { %v992_v8 = vpop.eup %991  ;;  %v474_v9 = vmul.f32 1.442695, %v857_v5  ;;  %v685_v0 = vpop.permute.xlu1 %684 }
  0xd5   : > { %v994_v10 = vpop.eup %993  ;;  %v477_v11 = vadd.f32 1.0, %v992_v8 }
  0xd6   : > { %995 = vpow2.f32 %v474_v9  ;;  %v480_v12 = vmul.f32 %v994_v10, %v476_v60  ;;  %vm485_vm0 = vweird.f32 %v994_v10 }
  0xd7   : > { %997 = vrcp.f32 %v477_v11  ;;  %vm486_vm2 = vmor %vm484_vm1, %vm485_vm0  ;;  %v505_v29 = vand.u32 2147483648, %v477_v11  ;;  %v503_v33 = vand.u32 2147483647, %v477_v11  ;;  %vm499_vm5 = vweird.f32 %v477_v11 }
  0xd8   : > { %v481_v13 = vsub.f32 1.0, %v480_v12 }
  0xd9   : > { %v506_v36 = vor.u32 1.1754944e-38, %v505_v29  ;;  %vm504_vm7 = vcmp.eq.f32.partialorder %v503_v33, 8.507059e+37 }
  0xda   : > { %v482_v15 = vmul.f32 %v994_v10, %v481_v13 }
  0xdc   : > { %v996_v17 = vpop.eup %995  ;;  %v483_v18 = vadd.f32 %v994_v10, %v482_v15 }
  0xdd   : > { %v998_v20 = vpop.eup %997  ;;  %v478_v21 = vadd.f32 1.0, %v996_v17 }
  0xde   : > { %v487_v24 = vsel %vm486_vm2, %v994_v10, %v483_v18  ;;  %v495_v25 = vmul.f32 %v998_v20, %v477_v11  ;;  %vm500_vm4 = vweird.f32 %v998_v20 }
  0xdf   : > { %999 = vrcp.f32 %v478_v21  ;;  %v492_v26 = vsel %vm489_vm3, %v491_v23, %v487_v24  ;;  %vm501_vm6 = vmor %vm499_vm5, %vm500_vm4  ;;  %v520_v42 = vand.u32 2147483648, %v478_v21  ;;  %v518_v45 = vand.u32 2147483647, %v478_v21 }
  0xe0   : > { %v524_v27 = vmul.f32 %v492_v26, %v1312_v32  ;;  %v496_v28 = vsub.f32 1.0, %v495_v25  ;;  %vm514_vm9 = vweird.f32 %v478_v21 }
  0xe1   : > { %v521_v47 = vor.u32 1.1754944e-38, %v520_v42  ;;  %vm519_vm11 = vcmp.eq.f32.partialorder %v518_v45, 8.507059e+37 }
  0xe2   : > { %v546_v30 = vmul.f32 %v534_v22, %v524_v27  ;;  %v497_v31 = vmul.f32 %v998_v20, %v496_v28 }
  0xe4   : > { %549 = vst [vmem:[#allocation2] sm:$0xff] %v546_v30  ;;  %v498_v34 = vadd.f32 %v998_v20, %v497_v31  ;;  %626 = vmatmul.f32.vlgmr.msra.gmra.mxu3 %v546_v30 }
  0xe5   : > { %v1000_v35 = vpop.eup %999 }
  0xe6   : > { %v502_v37 = vsel %vm501_vm6, %v998_v20, %v498_v34  ;;  %v510_v38 = vmul.f32 %v1000_v35, %v478_v21  ;;  %vm515_vm8 = vweird.f32 %v1000_v35 }
  0xe7   : > { %v507_v40 = vsel %vm504_vm7, %v506_v36, %v502_v37  ;;  %vm516_vm10 = vmor %vm514_vm9, %vm515_vm8 }
  0xe8   : > { %v525_v32 = vmul.f32 %v507_v40, %v1316_v48  ;;  %v511_v41 = vsub.f32 1.0, %v510_v38 }
  0xea   : > { %v547_v43 = vmul.f32 %v539_v39, %v525_v32  ;;  %v512_v44 = vmul.f32 %v1000_v35, %v511_v41 }
  0xec   : > { %550 = vst [vmem:[#allocation2 + $0x8] sm:$0xff] %v547_v43  ;;  %v513_v46 = vadd.f32 %v1000_v35, %v512_v44  ;;  %629 = vmatmul.f32.gmra.mxu3 %v547_v43 }
  0xee   : > { %v517_v49 = vsel %vm516_vm10, %v1000_v35, %v513_v46 }
  0xef   : > { %v522_v50 = vsel %vm519_vm11, %v521_v47, %v517_v49 }
  0xf0   : > { %v526_v51 = vmul.f32 %v522_v50, %v1320_v2 }
  0xf2   : > { %v548_v48 = vmul.f32 %v544_v52, %v526_v51 }
  0xf3   : > { %v554_v53 = vld [vmem:[#allocation2 + $0x1] sm:$0xff] }
  0xf4   : > { %v556_v54 = vld [vmem:[#allocation2 + $0x2] sm:$0xff]  ;;  %551 = vst [vmem:[#allocation2 + $0x10] sm:$0xff] %v548_v48  ;;  %649 = vmatmul.f32.vlgmr.msrb.gmra.mxu0 %v554_v53 }
  0xf5   : > { %672 = vmatmul.f32.vlgmr.msrb.gmra.mxu1 %v556_v54 }
  0xfb   : > { %v555_v55 = vld [vmem:[#allocation2 + $0x9] sm:$0xff] }
  0xfc   : > { %v557_v56 = vld [vmem:[#allocation2 + $0xa] sm:$0xff]  ;;  %652 = vmatmul.f32.vlgmr.msrb.gmra.mxu3 %v555_v55 }
  0xfd   : > { %675 = vmatmul.f32.vlgmr.msrb.gmra.mxu2 %v557_v56 }
 0x116   : > { %v690_v7 = vpop.permute.xlu2 %689 }
 0x167   : > { %v627_v58 = vpop.f32.mrf.mxu3 }
 0x168   : > { %v628_v59 = vadd.f32 %v988_v57, %v627_v58 }
 0x16f   : > { %v630_v2 = vpop.f32.mrf.mxu3 }
 0x170   : > { %v631_v3 = vadd.f32 %v988_v57, %v630_v2 }
 0x171   : > { %v650_v60 = vpop.f32.mrf.mxu0 }
 0x172   : > { %v651_v61 = vadd.f32 %v650_v60, %v628_v59  ;;  %v673_v62 = vpop.f32.mrf.mxu1 }
 0x174   : > { %v674_v63 = vadd.f32 %v673_v62, %v651_v61 }
 0x176   : > { %v692_v1 = vmul.f32 %v685_v0, %v674_v63 }
 0x178   : > { %694 = vst [vmem:[%s307_s11] sm:$0xff] %v692_v1 }
 0x17f   : > { %v653_v4 = vpop.f32.mrf.mxu3 }
 0x180   : > { %v654_v5 = vadd.f32 %v653_v4, %v631_v3  ;;  %v676_v6 = vpop.f32.mrf.mxu2 }
 0x182   : > { %v677_v8 = vadd.f32 %v676_v6, %v654_v5 }
 0x184   : > { %v693_v9 = vmul.f32 %v690_v7, %v677_v8 }
 0x186   : > { %695 = vst [vmem:[%s307_s11 + $0x8] sm:$0xff] %v693_v9 }
 0x187   : > { %1088 = shalt.err (!%p1085_p9)
}
 0x188   : > { %s1154_s30 = smov 128   ;;  %s1155_s11 = smov 8  }
 0x189   : > { %911 = dma.vmem_to_hbm [thread:$0]  (%p1231_p4), %s712_s16, 256, %s714_s17, %s697_s18, %s1154_s30, %s1154_s30, %s1155_s11  }
 0x18a PF: > { %p928_p10 = scmp.ge.s32.totalorder %s1147_s26, 2  ;;  %s728_s13 = sand.u32 1, %s1127_s21  }
 0x18b   : > { %s729_s14 = scalar_lea.sflag [#allocation5], %s728_s13 }
 0x18c   : > { %p921_p11 = pnand %p928_p10, %p1238_p8 }
 0x18e   : > { %p922_p12 = pneg %p921_p11 }
 0x190   : > { %1122 = dma.done.wait (%p922_p12), %s729_s14, 256  }
 0x191   : > { %1124 = vsyncadd (%p922_p12), %s729_s14, 4294967040  ;;  %s21_s26 = sadd.s32 1, %s1147_s26   ;;  %s1378_s21 = smov %s1131_s22 }
 0x192   : > { %p18_p13 = scmp.ge.s32.totalorder %s21_s26, 4   ;;  %s1379_s22 = smov %s1135_s23 }
 0x193   : > { %s1380_s23 = smov %s1244_s10  ;;  %s1381_s24 = smov %s1143_s25 }
 0x194   : > { %s1382_s25 = smov %s1384_s29  ;;  %20 = sbr.rel (!%p18_p13) target bundleno = 6 (0x6), region = 96 }
 0x199   :  { %735 = vsyncpa [#allocation4], 1 }
 0x19a   :  { %737 = vsyncpa [#allocation4 + $0x1], 1 }
 0x19b   :  { %738 = vsyncpa [#allocation7], 1 }
 0x19c   :  { %739 = vsyncpa [#allocation5], 1 }
 0x19d   :  { %741 = vsyncpa [#allocation5 + $0x1], 1 }

</bundles_post_ra>
